<compile_context>
chip_gen: v5e
topology: v5e:2x2
jax: 0.10.0
libtpu: 0.0.40
codegen_flags: <defaults>
</compile_context>

<pallas_src>
import jax
import jax.numpy as jnp
from jax.experimental import pallas as pl
from jax.experimental.pallas import tpu as pltpu

INPUT_SIZE = 100
LATENT_SIZE = 5
HIDDEN_SIZE = 64

LANE = 128       # hidden feature dims padded to one full lane width
MAX_TB = 4096    # max batch-tile rows (multiple of 8); ~12 MiB pipelined VMEM


# --------------------------------------------------------------------------
# Kernel: three fused matmuls + two ReLUs. x/out are lane-width 100 (full
# array dim); hidden dims are lane-dense 128.
# --------------------------------------------------------------------------
def _ae_kernel(x_ref,
               w1_ref, b1_ref,     # encoder L1:  (100, 128) / (1, 128)
               w23_ref, b23_ref,   # folded enc-L2 @ dec-L1: (128, 128) / (1, 128)
               w4_ref, b4_ref,     # decoder L2:  (128, 100) / (1, 100)
               o_ref):
    x = x_ref[...]                                                       # (tb, 100)

    h1 = jnp.dot(x, w1_ref[...], preferred_element_type=jnp.float32)    # (tb, 128)
    h1 = jnp.maximum(h1 + b1_ref[...], 0.0)                             # ReLU

    # Folded bottleneck: no activation between encoder-L2 and decoder-L1, so
    # (h1 @ w2 + b2) @ w3 + b3 == h1 @ (w2 @ w3) + (b2 @ w3 + b3).
    h2 = jnp.dot(h1, w23_ref[...], preferred_element_type=jnp.float32)  # (tb, 128)
    h2 = jnp.maximum(h2 + b23_ref[...], 0.0)                            # ReLU

    out = jnp.dot(h2, w4_ref[...], preferred_element_type=jnp.float32)  # (tb, 100)
    o_ref[...] = (out + b4_ref[...]).astype(o_ref.dtype)


# --------------------------------------------------------------------------
# Parameter packing: fold the bottleneck, pad only weight lane dims to 128.
# Done once, outside the per-call forward.
# --------------------------------------------------------------------------
def _pad2(a, rows, cols):
    return jnp.pad(a, ((0, rows - a.shape[0]), (0, cols - a.shape[1])))


def pack_params(params):
    w1, b1 = params["w1"], params["b1"]
    w2, b2 = params["w2"], params["b2"]
    w3, b3 = params["w3"], params["b3"]
    w4, b4 = params["w4"], params["b4"]

    w23 = w2 @ w3                    # (HID, HID)
    b23 = b2 @ w3 + b3               # (1, HID)

    return (_pad2(w1, INPUT_SIZE, LANE),   # (100, 128)
            _pad2(b1, 1, LANE),            # (1, 128)
            _pad2(w23, LANE, LANE),        # (128, 128)
            _pad2(b23, 1, LANE),           # (1, 128)
            _pad2(w4, LANE, INPUT_SIZE),   # (128, 100)
            b4)                            # (1, 100)


# --------------------------------------------------------------------------
# Forward: batch-tiled pallas_call, no wrapper-side activation copies.
# --------------------------------------------------------------------------
@jax.jit
def autoencoder_forward(x, packed):
    """x: (B, INPUT_SIZE) float32. packed: output of pack_params()."""
    w1p, b1p, w23p, b23p, w4p, b4p = packed
    B = x.shape[0]

    # Batch tile: multiple of 8, capped at MAX_TB; also capped to ~B/2 so the
    # grid has >= 2 steps whenever possible (v7x has 2 TensorCores).  For tiny
    # batches use tb == B (block dim equal to full array dim is always legal).
    if B <= 8:
        tb = B
    else:
        tb = min(MAX_TB, max(8, ((pl.cdiv(B, 2) + 7) // 8) * 8))
    grid = (pl.cdiv(B, tb),)

    # Advisory cost hint so XLA can schedule around this custom call.
    flops = 2 * B * (INPUT_SIZE * LANE + LANE * LANE + LANE * INPUT_SIZE)
    bytes_io = (2 * B * INPUT_SIZE
                + w1p.size + b1p.size + w23p.size + b23p.size
                + w4p.size + b4p.size) * 4
    cost = pl.CostEstimate(flops=flops, transcendentals=0,
                           bytes_accessed=bytes_io)

    x_spec = pl.BlockSpec((tb, INPUT_SIZE), lambda i: (i, 0))
    out_spec = pl.BlockSpec((tb, INPUT_SIZE), lambda i: (i, 0))

    def _const_spec(a):  # constant block index -> fetched once, VMEM-resident
        return pl.BlockSpec(a.shape, lambda i: (0, 0))

    out = pl.pallas_call(
        _ae_kernel,
        out_shape=jax.ShapeDtypeStruct((B, INPUT_SIZE), jnp.float32),
        grid_spec=pltpu.PrefetchScalarGridSpec(
            num_scalar_prefetch=0,
            grid=grid,
            in_specs=[x_spec,
                      _const_spec(w1p), _const_spec(b1p),
                      _const_spec(w23p), _const_spec(b23p),
                      _const_spec(w4p), _const_spec(b4p)],
            out_specs=out_spec),
        compiler_params=pltpu.CompilerParams(
            dimension_semantics=("parallel",),      # v7x megacore sharding
            vmem_limit_bytes=32 << 20),
        cost_estimate=cost,
    )(x, w1p, b1p, w23p, b23p, w4p, b4p)

    return out


# --------------------------------------------------------------------------
# Deterministic synthetic parameters + pure-JAX reference.
# --------------------------------------------------------------------------
def init_params(key):
    """PyTorch-style uniform fan-in init; weights stored (in, out)."""
    keys = jax.random.split(key, 8)

    def linear(kw, kb, fan_in, fan_out):
        bound = 1.0 / jnp.sqrt(fan_in)
        w = jax.random.uniform(kw, (fan_in, fan_out), jnp.float32, -bound, bound)
        b = jax.random.uniform(kb, (1, fan_out), jnp.float32, -bound, bound)
        return w, b

    w1, b1 = linear(keys[0], keys[1], INPUT_SIZE, HIDDEN_SIZE)
    w2, b2 = linear(keys[2], keys[3], HIDDEN_SIZE, LATENT_SIZE)
    w3, b3 = linear(keys[4], keys[5], LATENT_SIZE, HIDDEN_SIZE)
    w4, b4 = linear(keys[6], keys[7], HIDDEN_SIZE, INPUT_SIZE)
    return dict(w1=w1, b1=b1, w2=w2, b2=b2, w3=w3, b3=b3, w4=w4, b4=b4)


def reference_forward(x, p):
    h1 = jnp.maximum(x @ p["w1"] + p["b1"], 0.0)
    z = h1 @ p["w2"] + p["b2"]
    h2 = jnp.maximum(z @ p["w3"] + p["b3"], 0.0)
    return h2 @ p["w4"] + p["b4"]


if __name__ == "__main__":
    key = jax.random.PRNGKey(0)
    k_params, k_x, k_x2 = jax.random.split(key, 3)

    params = init_params(k_params)
    packed = jax.tree_util.tree_map(jax.block_until_ready, pack_params(params))

    # Small batch (single tile, block == full array).
    batch = 8
    x = jax.random.normal(k_x, (batch, INPUT_SIZE), jnp.float32)
    out = jax.block_until_ready(autoencoder_forward(x, packed))
    ref = reference_forward(x, params)
    assert out.shape == (batch, INPUT_SIZE)
    assert jnp.allclose(out, ref, atol=1e-4, rtol=1e-4), "mismatch (batch=8)"

    # Larger, non-multiple batch: exercises >=2 grid steps + masked tail tile.
    batch2 = 50
    x2 = jax.random.normal(k_x2, (batch2, INPUT_SIZE), jnp.float32)
    out2 = jax.block_until_ready(autoencoder_forward(x2, packed))
    ref2 = reference_forward(x2, params)
    assert out2.shape == (batch2, INPUT_SIZE)
    assert jnp.allclose(out2, ref2, atol=1e-4, rtol=1e-4), "mismatch (batch=50)"

    print("KERNEL_OK")
</pallas_src>

<mosaic_0001>
module attributes {stable_mosaic.version = 11 : i64} {
  func.func @_ae_kernel(%arg0: i32, %arg1: memref<8x100xf32, #tpu.memory_space<vmem>>, %arg2: memref<100x128xf32, #tpu.memory_space<vmem>>, %arg3: memref<1x128xf32, #tpu.memory_space<vmem>>, %arg4: memref<128x128xf32, #tpu.memory_space<vmem>>, %arg5: memref<1x128xf32, #tpu.memory_space<vmem>>, %arg6: memref<128x100xf32, #tpu.memory_space<vmem>>, %arg7: memref<1x100xf32, #tpu.memory_space<vmem>>, %arg8: memref<8x100xf32, #tpu.memory_space<vmem>>) attributes {dimension_semantics = [#tpu.dimension_semantics<parallel>], iteration_bounds = array<i64: 1>, scalar_prefetch = 0 : i64, scratch_operands = 0 : i64, tpu.core_type = #tpu.core_type<tc>, window_params = [{transform_indices = @transform_0, window_bounds = array<i64: 8, 100>}, {pipeline_mode = #tpu.pipeline_mode<synchronous>, transform_indices = @transform_1, window_bounds = array<i64: 100, 128>}, {pipeline_mode = #tpu.pipeline_mode<synchronous>, transform_indices = @transform_2, window_bounds = array<i64: 1, 128>}, {pipeline_mode = #tpu.pipeline_mode<synchronous>, transform_indices = @transform_3, window_bounds = array<i64: 128, 128>}, {pipeline_mode = #tpu.pipeline_mode<synchronous>, transform_indices = @transform_4, window_bounds = array<i64: 1, 128>}, {pipeline_mode = #tpu.pipeline_mode<synchronous>, transform_indices = @transform_5, window_bounds = array<i64: 128, 100>}, {pipeline_mode = #tpu.pipeline_mode<synchronous>, transform_indices = @transform_6, window_bounds = array<i64: 1, 100>}, {transform_indices = @transform_7, window_bounds = array<i64: 8, 100>}]} {
    %c0 = arith.constant 0 : index
    %c0_0 = arith.constant 0 : index
    %0 = vector.load %arg1[%c0, %c0_0] : memref<8x100xf32, #tpu.memory_space<vmem>>, vector<8x100xf32>
    %c0_1 = arith.constant 0 : index
    %c0_2 = arith.constant 0 : index
    %1 = vector.load %arg2[%c0_1, %c0_2] : memref<100x128xf32, #tpu.memory_space<vmem>>, vector<100x128xf32>
    %cst = arith.constant dense<0.000000e+00> : vector<8x128xf32>
    %2 = tpu.matmul %0, %1, %cst {dimension_numbers = #tpu.dot_dimension_numbers<[1], [0], [0], [1], [0, 0, 1, 1], [], []>} : vector<8x100xf32>, vector<100x128xf32>, vector<8x128xf32> -> vector<8x128xf32>
    %c0_3 = arith.constant 0 : index
    %c0_4 = arith.constant 0 : index
    %3 = vector.load %arg3[%c0_3, %c0_4] : memref<1x128xf32, #tpu.memory_space<vmem>>, vector<1x128xf32>
    %4 = vector.broadcast %3 : vector<1x128xf32> to vector<8x128xf32>
    %5 = arith.addf %2, %4 : vector<8x128xf32>
    %cst_5 = arith.constant 0.000000e+00 : f32
    %6 = vector.broadcast %cst_5 : f32 to vector<8x128xf32>
    %7 = arith.maximumf %5, %6 : vector<8x128xf32>
    %c0_6 = arith.constant 0 : index
    %c0_7 = arith.constant 0 : index
    %8 = vector.load %arg4[%c0_6, %c0_7] : memref<128x128xf32, #tpu.memory_space<vmem>>, vector<128x128xf32>
    %cst_8 = arith.constant dense<0.000000e+00> : vector<8x128xf32>
    %9 = tpu.matmul %7, %8, %cst_8 {dimension_numbers = #tpu.dot_dimension_numbers<[1], [0], [0], [1], [0, 0, 1, 1], [], []>} : vector<8x128xf32>, vector<128x128xf32>, vector<8x128xf32> -> vector<8x128xf32>
    %c0_9 = arith.constant 0 : index
    %c0_10 = arith.constant 0 : index
    %10 = vector.load %arg5[%c0_9, %c0_10] : memref<1x128xf32, #tpu.memory_space<vmem>>, vector<1x128xf32>
    %11 = vector.broadcast %10 : vector<1x128xf32> to vector<8x128xf32>
    %12 = arith.addf %9, %11 : vector<8x128xf32>
    %cst_11 = arith.constant 0.000000e+00 : f32
    %13 = vector.broadcast %cst_11 : f32 to vector<8x128xf32>
    %14 = arith.maximumf %12, %13 : vector<8x128xf32>
    %c0_12 = arith.constant 0 : index
    %c0_13 = arith.constant 0 : index
    %15 = vector.load %arg6[%c0_12, %c0_13] : memref<128x100xf32, #tpu.memory_space<vmem>>, vector<128x100xf32>
    %cst_14 = arith.constant dense<0.000000e+00> : vector<8x100xf32>
    %16 = tpu.matmul %14, %15, %cst_14 {dimension_numbers = #tpu.dot_dimension_numbers<[1], [0], [0], [1], [0, 0, 1, 1], [], []>} : vector<8x128xf32>, vector<128x100xf32>, vector<8x100xf32> -> vector<8x100xf32>
    %c0_15 = arith.constant 0 : index
    %c0_16 = arith.constant 0 : index
    %17 = vector.load %arg7[%c0_15, %c0_16] : memref<1x100xf32, #tpu.memory_space<vmem>>, vector<1x100xf32>
    %18 = vector.broadcast %17 : vector<1x100xf32> to vector<8x100xf32>
    %19 = arith.addf %16, %18 : vector<8x100xf32>
    %c0_17 = arith.constant 0 : index
    %c0_18 = arith.constant 0 : index
    %20 = vector.load %arg8[%c0_17, %c0_18] : memref<8x100xf32, #tpu.memory_space<vmem>>, vector<8x100xf32>
    tpu.vector_store %arg8[%c0_17, %c0_18], %19 {strides = array<i32>} : memref<8x100xf32, #tpu.memory_space<vmem>>, vector<8x100xf32>,
    return
  }
  func.func @transform_0(%arg0: i32) -> (i32, i32) {
    %c0_i32 = arith.constant 0 : i32
    %c0_i32_0 = arith.constant 0 : i32
    return %arg0, %c0_i32 : i32, i32
  }
  func.func @transform_1(%arg0: i32) -> (i32, i32) {
    %c0_i32 = arith.constant 0 : i32
    %c0_i32_0 = arith.constant 0 : i32
    %c0_i32_1 = arith.constant 0 : i32
    return %c0_i32, %c0_i32_0 : i32, i32
  }
  func.func @transform_2(%arg0: i32) -> (i32, i32) {
    %c0_i32 = arith.constant 0 : i32
    %c0_i32_0 = arith.constant 0 : i32
    %c0_i32_1 = arith.constant 0 : i32
    return %c0_i32, %c0_i32_0 : i32, i32
  }
  func.func @transform_3(%arg0: i32) -> (i32, i32) {
    %c0_i32 = arith.constant 0 : i32
    %c0_i32_0 = arith.constant 0 : i32
    %c0_i32_1 = arith.constant 0 : i32
    return %c0_i32, %c0_i32_0 : i32, i32
  }
  func.func @transform_4(%arg0: i32) -> (i32, i32) {
    %c0_i32 = arith.constant 0 : i32
    %c0_i32_0 = arith.constant 0 : i32
    %c0_i32_1 = arith.constant 0 : i32
    return %c0_i32, %c0_i32_0 : i32, i32
  }
  func.func @transform_5(%arg0: i32) -> (i32, i32) {
    %c0_i32 = arith.constant 0 : i32
    %c0_i32_0 = arith.constant 0 : i32
    %c0_i32_1 = arith.constant 0 : i32
    return %c0_i32, %c0_i32_0 : i32, i32
  }
  func.func @transform_6(%arg0: i32) -> (i32, i32) {
    %c0_i32 = arith.constant 0 : i32
    %c0_i32_0 = arith.constant 0 : i32
    %c0_i32_1 = arith.constant 0 : i32
    return %c0_i32, %c0_i32_0 : i32, i32
  }
  func.func @transform_7(%arg0: i32) -> (i32, i32) {
    %c0_i32 = arith.constant 0 : i32
    %c0_i32_0 = arith.constant 0 : i32
    return %arg0, %c0_i32 : i32, i32
  }
}

</mosaic_0001>

<bundles_post_ra>
// kernel: autoencoder_forward.1
= control target key start
LH: loop header
LB: loop body
LE: loop exit
PB: predicated region body
PF: predicated region fallthrough
CT: control target
= control target key end

     0   :  { %12 = vsyncpa [#allocation3], 0  ;;  %s440_s0 = inlined_call_operand.hbm [shape: f32[8,100], index: 0, kind: input, shape index: {}]   ;;  %s441_s1 = inlined_call_operand.vmem [shape: f32[100,128], index: 1, kind: input, shape index: {}]   ;;  %s442_s2 = inlined_call_operand.vmem [shape: f32[1,128], index: 2, kind: input, shape index: {}]   ;;  %s443_s3 = inlined_call_operand.vmem [shape: f32[128,128], index: 3, kind: input, shape index: {}]   ;;  %s444_s4 = inlined_call_operand.vmem [shape: f32[1,128], index: 4, kind: input, shape index: {}]   ;;  %s445_s5 = inlined_call_operand.vmem [shape: f32[128,100], index: 5, kind: input, shape index: {}]   ;;  %s446_s6 = inlined_call_operand.vmem [shape: f32[1,100], index: 6, kind: input, shape index: {}]   ;;  %s447_s7 = inlined_call_operand.hbm [shape: f32[8,100], index: 7, kind: output, shape index: {}]  }
   0x1   :  { %13 = vsyncpa [#allocation4], 0  ;;  %s19_s26 = sshll.u32 %s440_s0, 4  ;;  %s246_s27 = smov [#allocation2]   ;;  %s20_s26 = int_to_ptr.hbm [resolvable:$true] %s19_s26 }
   0x2   :  { %s21_s28 = sshll.u32 %s246_s27, 4  ;;  %s22_s28 = int_to_ptr.vmem [resolvable:$true] %s21_s28 }
   0x3   :  { %24 = dma.hbm_to_vmem [thread:$0]  %s20_s26, 128, %s22_s28, [#allocation3]  }
   0x4   :  { %242 = dma.done.wait [#allocation3], 128  }
   0x5   :  { %243 = vsyncadd [#allocation3], 4294967168  ;;  %vm63_vm0 = vcmask 1043456   ;;  %v54_v0 = vld [vmem:[%s441_s1 + $0x60] sm:$0xf]  ;;  %v53_v1 = vld [vmem:[%s441_s1 + $0x58] sm:$0xff] }
   0x6   :  { %187 = vmatpush.msk.msra.mxu0 %vm63_vm0, %v54_v0  ;;  %v52_v2 = vld [vmem:[%s441_s1 + $0x50] sm:$0xff]  ;;  %v51_v3 = vld [vmem:[%s441_s1 + $0x48] sm:$0xff]  ;;  %v103_v4 = vld [vmem:[%s443_s3 + $0x78] sm:$0xff]  ;;  %vm59_vm1 = vcmask 818176   ;;  %s247_s24 = smov [#allocation5]   ;;  %s177_s28 = sshll.u32 %s447_s7, 4  ;;  %s178_s28 = int_to_ptr.hbm [resolvable:$true] %s177_s28 }
   0x7   :  { %108 = vmatpush.msra.mxu1 %v103_v4  ;;  %v102_v5 = vld [vmem:[%s443_s3 + $0x70] sm:$0xff]  ;;  %v50_v6 = vld [vmem:[%s441_s1 + $0x40] sm:$0xff]  ;;  %v101_v7 = vld [vmem:[%s443_s3 + $0x68] sm:$0xff]  ;;  %s175_s25 = sshll.u32 %s247_s24, 4  ;;  %s176_s25 = int_to_ptr.vmem [resolvable:$true] %s175_s25 }
   0x8   :  { %71 = vmatpush.msra.mxu0 %v53_v1  ;;  %v49_v8 = vld [vmem:[%s441_s1 + $0x38] sm:$0xff]  ;;  %v100_v9 = vld [vmem:[%s443_s3 + $0x60] sm:$0xff]  ;;  %v48_v10 = vld [vmem:[%s441_s1 + $0x30] sm:$0xff] }
   0x9   :  { %109 = vmatpush.msra.mxu1 %v102_v5  ;;  %v99_v11 = vld [vmem:[%s443_s3 + $0x58] sm:$0xff]  ;;  %v47_v12 = vld [vmem:[%s441_s1 + $0x28] sm:$0xff]  ;;  %v98_v13 = vld [vmem:[%s443_s3 + $0x50] sm:$0xff] }
   0xa   :  { %72 = vmatpush.msra.mxu0 %v52_v2  ;;  %v46_v14 = vld [vmem:[%s441_s1 + $0x20] sm:$0xff]  ;;  %v97_v15 = vld [vmem:[%s443_s3 + $0x48] sm:$0xff]  ;;  %v45_v16 = vld [vmem:[%s441_s1 + $0x18] sm:$0xff] }
   0xb   :  { %110 = vmatpush.msra.mxu1 %v101_v7  ;;  %v96_v17 = vld [vmem:[%s443_s3 + $0x40] sm:$0xff]  ;;  %v44_v18 = vld [vmem:[%s441_s1 + $0x10] sm:$0xff]  ;;  %v95_v19 = vld [vmem:[%s443_s3 + $0x38] sm:$0xff] }
   0xc   :  { %73 = vmatpush.msra.mxu0 %v51_v3  ;;  %v43_v20 = vld [vmem:[%s441_s1 + $0x8] sm:$0xff]  ;;  %v94_v21 = vld [vmem:[%s443_s3 + $0x30] sm:$0xff]  ;;  %v42_v22 = vld [vmem:[%s441_s1] sm:$0xff] }
   0xd   :  { %111 = vmatpush.msra.mxu1 %v100_v9  ;;  %v93_v23 = vld [vmem:[%s443_s3 + $0x28] sm:$0xff]  ;;  %v41_v24 = vld [vmem:[#allocation2] sm:$0xff]  ;;  %v91_v26 = vld [vmem:[%s443_s3 + $0x18] sm:$0xff] }
   0xe   :  { %74 = vmatpush.msra.mxu0 %v50_v6  ;;  %v92_v25 = vld [vmem:[%s443_s3 + $0x20] sm:$0xff]  ;;  %v90_v27 = vld [vmem:[%s443_s3 + $0x10] sm:$0xff]  ;;  %v89_v28 = vld [vmem:[%s443_s3 + $0x8] sm:$0xff] }
   0xf   :  { %112 = vmatpush.msra.mxu1 %v99_v11  ;;  %v88_v29 = vld [vmem:[%s443_s3] sm:$0xff]  ;;  %v144_v30 = vld [vmem:[%s445_s5 + $0x78] sm:$0xff]  ;;  %v143_v31 = vld [vmem:[%s445_s5 + $0x70] sm:$0xff] }
  0x10   :  { %75 = vmatpush.msra.mxu0 %v49_v8  ;;  %149 = vmatpush.msra.mxu2 %v144_v30  ;;  %v142_v32 = vld [vmem:[%s445_s5 + $0x68] sm:$0xff]  ;;  %v141_v33 = vld [vmem:[%s445_s5 + $0x60] sm:$0xff]  ;;  %v140_v34 = vld [vmem:[%s445_s5 + $0x58] sm:$0xff] }
  0x11   :  { %113 = vmatpush.msra.mxu1 %v98_v13  ;;  %v139_v35 = vld [vmem:[%s445_s5 + $0x50] sm:$0xff]  ;;  %v138_v36 = vld [vmem:[%s445_s5 + $0x48] sm:$0xff]  ;;  %v137_v37 = vld [vmem:[%s445_s5 + $0x40] sm:$0xff] }
  0x12   :  { %76 = vmatpush.msra.mxu0 %v48_v10  ;;  %150 = vmatpush.msra.mxu2 %v143_v31  ;;  %v136_v38 = vld [vmem:[%s445_s5 + $0x38] sm:$0xff]  ;;  %v135_v39 = vld [vmem:[%s445_s5 + $0x30] sm:$0xff]  ;;  %v134_v40 = vld [vmem:[%s445_s5 + $0x28] sm:$0xff] }
  0x13   :  { %114 = vmatpush.msra.mxu1 %v97_v15  ;;  %v133_v41 = vld [vmem:[%s445_s5 + $0x20] sm:$0xff]  ;;  %v132_v42 = vld [vmem:[%s445_s5 + $0x18] sm:$0xff]  ;;  %v131_v47 = vld [vmem:[%s445_s5 + $0x10] sm:$0xff] }
  0x14   :  { %77 = vmatpush.msra.mxu0 %v47_v12  ;;  %151 = vmatpush.msra.mxu2 %v142_v32  ;;  %v191_v43 = vld [vmem:[%s442_s2] ss:$0 sm:$0xff]  ;;  %v130_v48 = vld [vmem:[%s445_s5 + $0x8] sm:$0xff] }
  0x15   :  { %115 = vmatpush.msra.mxu1 %v96_v17  ;;  %v129_v49 = vld [vmem:[%s445_s5] sm:$0xff] }
  0x16   :  { %78 = vmatpush.msra.mxu0 %v46_v14  ;;  %152 = vmatpush.msra.mxu2 %v141_v33  ;;  %v192_v50 = vld [vmem:[%s444_s4] ss:$0 sm:$0xff] }
  0x17   :  { %116 = vmatpush.msra.mxu1 %v95_v19  ;;  %v193_v54 = vld [vmem:[%s446_s6] ss:$0 sm:$0xff] }
  0x18   :  { %79 = vmatpush.msra.mxu0 %v45_v16  ;;  %153 = vmatpush.msra.mxu2 %v140_v34 }
  0x19   :  { %117 = vmatpush.msra.mxu1 %v94_v21 }
  0x1a   :  { %80 = vmatpush.msra.mxu0 %v44_v18  ;;  %154 = vmatpush.msra.mxu2 %v139_v35 }
  0x1b   :  { %118 = vmatpush.msra.mxu1 %v93_v23 }
  0x1c   :  { %81 = vmatpush.msra.mxu0 %v43_v20  ;;  %155 = vmatpush.msra.mxu2 %v138_v36 }
  0x1d   :  { %119 = vmatpush.msra.mxu1 %v92_v25 }
  0x1e   :  { %82 = vmatpush.msra.mxu0 %v42_v22  ;;  %156 = vmatpush.msra.mxu2 %v137_v37 }
  0x1f   :  { %188 = vmatmul.msk.f32.vlgmr.msra.gmra.mxu0 %vm59_vm1, %v41_v24  ;;  %120 = vmatpush.msra.mxu1 %v91_v26 }
  0x20   :  { %157 = vmatpush.msra.mxu2 %v136_v38 }
  0x21   :  { %121 = vmatpush.msra.mxu1 %v90_v27 }
  0x22   :  { %158 = vmatpush.msra.mxu2 %v135_v39 }
  0x23   :  { %122 = vmatpush.msra.mxu1 %v89_v28 }
  0x24   :  { %159 = vmatpush.msra.mxu2 %v134_v40 }
  0x25   :  { %123 = vmatpush.msra.mxu1 %v88_v29 }
  0x26   :  { %160 = vmatpush.msra.mxu2 %v133_v41 }
  0x28   :  { %161 = vmatpush.msra.mxu2 %v132_v42 }
  0x2a   :  { %162 = vmatpush.msra.mxu2 %v131_v47 }
  0x2c   :  { %163 = vmatpush.msra.mxu2 %v130_v48 }
  0x2e   :  { %164 = vmatpush.msra.mxu2 %v129_v49 }
  0x9c   :  { %v84_v44 = vpop.f32.mrf.mxu0 }
  0x9d   :  { %v85_v45 = vadd.f32 %v191_v43, %v84_v44 }
  0x9f   :  { %v87_v46 = vmax.f32 %v85_v45, 0.0 }
  0xa1   :  { %124 = vmatmul.f32.vlgmr.msra.gmra.mxu1 %v87_v46 }
 0x11e   :  { %v125_v51 = vpop.f32.mrf.mxu1 }
 0x11f   :  { %v126_v52 = vadd.f32 %v192_v50, %v125_v51 }
 0x121   :  { %v128_v53 = vmax.f32 %v126_v52, 0.0 }
 0x123   :  { %165 = vmatmul.f32.vlgmr.msra.gmra.mxu2 %v128_v53 }
 0x1a6   :  { %v166_v55 = vpop.f32.mrf.mxu2 }
 0x1a7   :  { %v167_v56 = vadd.f32 %v193_v54, %v166_v55 }
 0x1a9   :  { %169 = vst.msk [vmem:[#allocation5] sm:$0xff] %vm59_vm1, %v167_v56 }
 0x1aa   :  { %180 = dma.vmem_to_hbm [thread:$0]  %s176_s25, 128, %s178_s28, [#allocation4]  }
 0x1ab   :  { %244 = dma.done.wait [#allocation4], 128  }
 0x1ac   :  { %245 = vsyncadd [#allocation4], 4294967168 }
 0x1ad   :  { %185 = vsyncpa [#allocation3], 1 }
 0x1ae   :  { %186 = vsyncpa [#allocation4], 1 }

</bundles_post_ra>
